<compile_context>
chip_gen: v7x
topology: tpu7x:2x2x1
jax: 0.10.0
libtpu: 0.0.40
codegen_flags: <defaults>
</compile_context>

<pallas_src>
import jax
import jax.numpy as jnp
from jax.experimental import pallas as pl
from jax.experimental.pallas import tpu as pltpu

PAD = 128  # lane-dense width used for the hidden dimension padding


def dann_forward_kernel(x_ref, w1_ref, b1_ref, w23_ref, mediate_ref, y_ref):
    # x: (tile_b, input_dim) narrow block — Mosaic zero-pads the K dim for MXU.
    x = x_ref[...]
    # layer1a: Linear + bias + ReLU.  b1 carries a constant 1.0 in lane
    # `hidden_dim` so the biases of layers 2/3 can be folded into their weights.
    h1 = jnp.dot(x, w1_ref[...], preferred_element_type=jnp.float32)
    h1 = jnp.maximum(h1 + b1_ref[...], 0.0)                 # (tile_b, PAD) f32
    # layer1b: Linear (+bias folded) + ReLU.
    h2 = jnp.dot(h1.astype(w23_ref.dtype), w23_ref[0],
                 preferred_element_type=jnp.float32)
    h2 = jnp.maximum(h2, 0.0)                                # (tile_b, PAD) f32
    mediate_ref[...] = h2[:, :mediate_ref.shape[-1]].astype(mediate_ref.dtype)
    # layer2: Linear (+bias folded).
    y = jnp.dot(h2.astype(w23_ref.dtype), w23_ref[1],
                preferred_element_type=jnp.float32)
    y_ref[...] = y[:, :y_ref.shape[-1]].astype(y_ref.dtype)


def _round_up(n, m):
    return ((n + m - 1) // m) * m


def pack_params(params, input_dim, hidden_dim, output_dim, op_dtype=jnp.bfloat16):
    """Pack (w1,b1,w2,b2,w3,b3) into (w1_pad, b1_pad, w23_slab).

    w1_pad : (input_dim, PAD) op_dtype — layer-1 weights, zero-padded columns.
    b1_pad : (1, PAD) float32 — layer-1 bias + constant 1.0 at lane hidden_dim
             (relu(1)=1 carries the constant through the network).
    w23    : (2, PAD, PAD) op_dtype — layers 2/3 weights with their biases
             folded into row hidden_dim (multiplied by the constant-1 lane).
    """
    w1, b1, w2, b2, w3, b3 = params
    assert hidden_dim + 1 <= PAD and input_dim <= PAD and output_dim <= PAD
    ones_h = hidden_dim  # lane that carries the constant 1.0 through h1 / h2

    w1_pad = jnp.zeros((input_dim, PAD), jnp.float32).at[:, :hidden_dim].set(w1)

    b1_pad = jnp.zeros((1, PAD), jnp.float32)
    b1_pad = b1_pad.at[0, :hidden_dim].set(b1.reshape(-1))
    b1_pad = b1_pad.at[0, ones_h].set(1.0)                  # h1[:, ones_h] = 1

    W2 = jnp.zeros((PAD, PAD), jnp.float32)
    W2 = W2.at[:hidden_dim, :hidden_dim].set(w2)
    W2 = W2.at[ones_h, :hidden_dim].set(b2.reshape(-1))
    W2 = W2.at[ones_h, ones_h].set(1.0)                     # h2[:, ones_h] = 1

    W3 = jnp.zeros((PAD, PAD), jnp.float32)
    W3 = W3.at[:hidden_dim, :output_dim].set(w3)
    W3 = W3.at[ones_h, :output_dim].set(b3.reshape(-1))

    return (w1_pad.astype(op_dtype), b1_pad, jnp.stack([W2, W3]).astype(op_dtype))


def net_dann_forward(x, params, *, use_bf16=True, tile_b=None):
    """Returns (mediate, y) exactly like net_DANN.forward."""
    w1, w3 = params[0], params[4]
    batch, input_dim = x.shape
    hidden_dim = w1.shape[1]
    output_dim = w3.shape[1]

    op_dtype = jnp.bfloat16 if use_bf16 else jnp.float32
    w1_pad, b1_pad, w23 = pack_params(params, input_dim, hidden_dim, output_dim,
                                      op_dtype=op_dtype)

    # Batch tiling: big tiles amortize the ~0.35 us/step overhead; keep >=2
    # grid steps for very large batches so both v7x TensorCores get work.
    if tile_b is None:
        if batch >= 4096:
            tile_b = 2048
        elif batch >= 2048:
            tile_b = 1024
        else:
            tile_b = max(8, _round_up(batch, 8))
    b_pad = _round_up(batch, tile_b)

    # Only the batch dim is padded (11-wide rows — negligible traffic).
    x_in = x.astype(op_dtype)
    if b_pad != batch:
        x_in = jnp.pad(x_in, ((0, b_pad - batch), (0, 0)))

    grid = (b_pad // tile_b,)
    itemsize = jnp.dtype(op_dtype).itemsize
    flops = 2 * b_pad * (input_dim * PAD + 2 * PAD * PAD)
    bytes_accessed = (b_pad * input_dim * itemsize            # x stream
                      + w1_pad.size * itemsize + b1_pad.size * 4
                      + w23.size * itemsize                   # weights (once)
                      + b_pad * hidden_dim * 4                # mediate out
                      + b_pad * output_dim * 4)               # y out

    mediate_p, y_p = pl.pallas_call(
        dann_forward_kernel,
        out_shape=(
            jax.ShapeDtypeStruct((b_pad, hidden_dim), jnp.float32),
            jax.ShapeDtypeStruct((b_pad, output_dim), jnp.float32),
        ),
        grid=grid,
        in_specs=[
            pl.BlockSpec((tile_b, input_dim), lambda i: (i, 0)),
            pl.BlockSpec((input_dim, PAD), lambda i: (0, 0)),   # VMEM-resident
            pl.BlockSpec((1, PAD), lambda i: (0, 0)),           # VMEM-resident
            pl.BlockSpec((2, PAD, PAD), lambda i: (0, 0, 0)),   # VMEM-resident
        ],
        out_specs=(
            pl.BlockSpec((tile_b, hidden_dim), lambda i: (i, 0)),
            pl.BlockSpec((tile_b, output_dim), lambda i: (i, 0)),
        ),
        compiler_params=pltpu.CompilerParams(
            dimension_semantics=("parallel",)),
        cost_estimate=pl.CostEstimate(
            flops=flops, transcendentals=0, bytes_accessed=bytes_accessed),
    )(x_in, w1_pad, b1_pad, w23)

    if b_pad != batch:
        mediate_p = mediate_p[:batch]
        y_p = y_p[:batch]
    return mediate_p, y_p


def init_params(key, input_dim, hidden_dim, output_dim):
    """Deterministic init mimicking nn.Linear default U[-1/sqrt(fan_in), +1/sqrt(fan_in)]."""
    def linear(key, fan_in, fan_out):
        kw, kb = jax.random.split(key)
        bound = 1.0 / jnp.sqrt(jnp.float32(fan_in))
        w = jax.random.uniform(kw, (fan_in, fan_out), jnp.float32, -bound, bound)
        b = jax.random.uniform(kb, (1, fan_out), jnp.float32, -bound, bound)
        return w, b

    k1, k2, k3 = jax.random.split(key, 3)
    w1, b1 = linear(k1, input_dim, hidden_dim)
    w2, b2 = linear(k2, hidden_dim, hidden_dim)
    w3, b3 = linear(k3, hidden_dim, output_dim)
    return (w1, b1, w2, b2, w3, b3)


def reference_forward(x, params):
    w1, b1, w2, b2, w3, b3 = params
    h1 = jnp.maximum(x @ w1 + b1, 0.0)
    h2 = jnp.maximum(h1 @ w2 + b2, 0.0)
    y = h2 @ w3 + b3
    return h2, y


if __name__ == "__main__":
    # Wine-quality regression: 11 input features, hidden=32, scalar output.
    batch, input_dim, hidden_dim, output_dim = 8, 11, 32, 1

    key = jax.random.PRNGKey(0)
    kx, kp, kx2 = jax.random.split(key, 3)
    x = jax.random.normal(kx, (batch, input_dim), dtype=jnp.float32)
    params = init_params(kp, input_dim, hidden_dim, output_dim)
    med_ref, y_ref = reference_forward(x, params)

    # f32 operand path — exact vs reference.
    mediate, y = net_dann_forward(x, params, use_bf16=False)
    jax.block_until_ready((mediate, y))
    assert mediate.shape == (batch, hidden_dim)
    assert y.shape == (batch, output_dim)
    assert jnp.allclose(mediate, med_ref, atol=1e-5, rtol=1e-5)
    assert jnp.allclose(y, y_ref, atol=1e-5, rtol=1e-5)

    # Default bf16 dot operands (f32 accumulation) — loose tolerance.
    med16, y16 = net_dann_forward(x, params)
    jax.block_until_ready((med16, y16))
    assert jnp.allclose(med16, med_ref, atol=1e-1, rtol=1e-1)
    assert jnp.allclose(y16, y_ref, atol=1e-1, rtol=1e-1)

    # Larger batch exercising batch padding + the grid path.
    big_batch = 1000
    xb = jax.random.normal(kx2, (big_batch, input_dim), dtype=jnp.float32)
    med_b_ref, y_b_ref = reference_forward(xb, params)

    med_b, y_b = net_dann_forward(xb, params, use_bf16=False, tile_b=512)
    jax.block_until_ready((med_b, y_b))
    assert med_b.shape == (big_batch, hidden_dim)
    assert y_b.shape == (big_batch, output_dim)
    assert jnp.allclose(med_b, med_b_ref, atol=1e-4, rtol=1e-4)
    assert jnp.allclose(y_b, y_b_ref, atol=1e-4, rtol=1e-4)

    med_b16, y_b16 = net_dann_forward(xb, params)   # bf16 default, single tile
    jax.block_until_ready((med_b16, y_b16))
    assert jnp.allclose(med_b16, med_b_ref, atol=1e-1, rtol=1e-1)
    assert jnp.allclose(y_b16, y_b_ref, atol=1e-1, rtol=1e-1)

    print("KERNEL_OK")
</pallas_src>

<mosaic_0001>
module attributes {stable_mosaic.version = 11 : i64} {
  func.func @dann_forward_kernel(%arg0: i32, %arg1: memref<8x11xf32, #tpu.memory_space<vmem>>, %arg2: memref<11x128xf32, #tpu.memory_space<vmem>>, %arg3: memref<1x128xf32, #tpu.memory_space<vmem>>, %arg4: memref<2x128x128xf32, #tpu.memory_space<vmem>>, %arg5: memref<8x32xf32, #tpu.memory_space<vmem>>, %arg6: memref<8x1xf32, #tpu.memory_space<vmem>>) attributes {dimension_semantics = [#tpu.dimension_semantics<parallel>], iteration_bounds = array<i64: 1>, scalar_prefetch = 0 : i64, scratch_operands = 0 : i64, tpu.core_type = #tpu.core_type<tc>, window_params = [{transform_indices = @transform_0, window_bounds = array<i64: 8, 11>}, {pipeline_mode = #tpu.pipeline_mode<synchronous>, transform_indices = @transform_1, window_bounds = array<i64: 11, 128>}, {pipeline_mode = #tpu.pipeline_mode<synchronous>, transform_indices = @transform_2, window_bounds = array<i64: 1, 128>}, {pipeline_mode = #tpu.pipeline_mode<synchronous>, transform_indices = @transform_3, window_bounds = array<i64: 2, 128, 128>}, {transform_indices = @transform_4, window_bounds = array<i64: 8, 32>}, {transform_indices = @transform_5, window_bounds = array<i64: 8, 1>}]} {
    %c0 = arith.constant 0 : index
    %c0_0 = arith.constant 0 : index
    %0 = vector.load %arg1[%c0, %c0_0] : memref<8x11xf32, #tpu.memory_space<vmem>>, vector<8x11xf32>
    %c0_1 = arith.constant 0 : index
    %c0_2 = arith.constant 0 : index
    %1 = vector.load %arg2[%c0_1, %c0_2] : memref<11x128xf32, #tpu.memory_space<vmem>>, vector<11x128xf32>
    %cst = arith.constant dense<0.000000e+00> : vector<8x128xf32>
    %2 = tpu.matmul %0, %1, %cst {dimension_numbers = #tpu.dot_dimension_numbers<[1], [0], [0], [1], [0, 0, 1, 1], [], []>} : vector<8x11xf32>, vector<11x128xf32>, vector<8x128xf32> -> vector<8x128xf32>
    %c0_3 = arith.constant 0 : index
    %c0_4 = arith.constant 0 : index
    %3 = vector.load %arg3[%c0_3, %c0_4] : memref<1x128xf32, #tpu.memory_space<vmem>>, vector<1x128xf32>
    %4 = vector.broadcast %3 : vector<1x128xf32> to vector<8x128xf32>
    %5 = arith.addf %2, %4 : vector<8x128xf32>
    %cst_5 = arith.constant 0.000000e+00 : f32
    %6 = vector.broadcast %cst_5 : f32 to vector<8x128xf32>
    %7 = arith.maximumf %5, %6 : vector<8x128xf32>
    %c0_6 = arith.constant 0 : index
    %c0_7 = arith.constant 0 : index
    %c0_8 = arith.constant 0 : index
    %8 = vector.load %arg4[%c0_6, %c0_7, %c0_8] : memref<2x128x128xf32, #tpu.memory_space<vmem>>, vector<1x128x128xf32>
    %9 = vector.shape_cast %8 : vector<1x128x128xf32> to vector<128x128xf32>
    %cst_9 = arith.constant dense<0.000000e+00> : vector<8x128xf32>
    %10 = tpu.matmul %7, %9, %cst_9 {dimension_numbers = #tpu.dot_dimension_numbers<[1], [0], [0], [1], [0, 0, 1, 1], [], []>} : vector<8x128xf32>, vector<128x128xf32>, vector<8x128xf32> -> vector<8x128xf32>
    %cst_10 = arith.constant 0.000000e+00 : f32
    %11 = vector.broadcast %cst_10 : f32 to vector<8x128xf32>
    %12 = arith.maximumf %10, %11 : vector<8x128xf32>
    %13 = vector.extract_strided_slice %12 {offsets = [0, 0], sizes = [8, 32], strides = [1, 1]} : vector<8x128xf32> to vector<8x32xf32>
    %c0_11 = arith.constant 0 : index
    %c0_12 = arith.constant 0 : index
    %14 = vector.load %arg5[%c0_11, %c0_12] : memref<8x32xf32, #tpu.memory_space<vmem>>, vector<8x32xf32>
    tpu.vector_store %arg5[%c0_11, %c0_12], %13 {strides = array<i32>} : memref<8x32xf32, #tpu.memory_space<vmem>>, vector<8x32xf32>,
    %c1 = arith.constant 1 : index
    %c0_13 = arith.constant 0 : index
    %c0_14 = arith.constant 0 : index
    %15 = vector.load %arg4[%c1, %c0_13, %c0_14] : memref<2x128x128xf32, #tpu.memory_space<vmem>>, vector<1x128x128xf32>
    %16 = vector.shape_cast %15 : vector<1x128x128xf32> to vector<128x128xf32>
    %cst_15 = arith.constant dense<0.000000e+00> : vector<8x128xf32>
    %17 = tpu.matmul %12, %16, %cst_15 {dimension_numbers = #tpu.dot_dimension_numbers<[1], [0], [0], [1], [0, 0, 1, 1], [], []>} : vector<8x128xf32>, vector<128x128xf32>, vector<8x128xf32> -> vector<8x128xf32>
    %18 = vector.extract_strided_slice %17 {offsets = [0, 0], sizes = [8, 1], strides = [1, 1]} : vector<8x128xf32> to vector<8x1xf32>
    %c0_16 = arith.constant 0 : index
    %c0_17 = arith.constant 0 : index
    %19 = vector.load %arg6[%c0_16, %c0_17] : memref<8x1xf32, #tpu.memory_space<vmem>>, vector<8x1xf32>
    tpu.vector_store %arg6[%c0_16, %c0_17], %18 {strides = array<i32>} : memref<8x1xf32, #tpu.memory_space<vmem>>, vector<8x1xf32>,
    return
  }
  func.func @transform_0(%arg0: i32) -> (i32, i32) {
    %c0_i32 = arith.constant 0 : i32
    %c0_i32_0 = arith.constant 0 : i32
    return %arg0, %c0_i32 : i32, i32
  }
  func.func @transform_1(%arg0: i32) -> (i32, i32) {
    %c0_i32 = arith.constant 0 : i32
    %c0_i32_0 = arith.constant 0 : i32
    %c0_i32_1 = arith.constant 0 : i32
    return %c0_i32, %c0_i32_0 : i32, i32
  }
  func.func @transform_2(%arg0: i32) -> (i32, i32) {
    %c0_i32 = arith.constant 0 : i32
    %c0_i32_0 = arith.constant 0 : i32
    %c0_i32_1 = arith.constant 0 : i32
    return %c0_i32, %c0_i32_0 : i32, i32
  }
  func.func @transform_3(%arg0: i32) -> (i32, i32, i32) {
    %c0_i32 = arith.constant 0 : i32
    %c0_i32_0 = arith.constant 0 : i32
    %c0_i32_1 = arith.constant 0 : i32
    %c0_i32_2 = arith.constant 0 : i32
    return %c0_i32, %c0_i32_0, %c0_i32_1 : i32, i32, i32
  }
  func.func @transform_4(%arg0: i32) -> (i32, i32) {
    %c0_i32 = arith.constant 0 : i32
    %c0_i32_0 = arith.constant 0 : i32
    return %arg0, %c0_i32 : i32, i32
  }
  func.func @transform_5(%arg0: i32) -> (i32, i32) {
    %c0_i32 = arith.constant 0 : i32
    %c0_i32_0 = arith.constant 0 : i32
    return %arg0, %c0_i32 : i32, i32
  }
}

</mosaic_0001>

<bundles_post_ra>
// kernel: tpu_custom_call.1
= control target key start
LH: loop header
LB: loop body
LE: loop exit
PB: predicated region body
PF: predicated region fallthrough
CT: control target
= control target key end

     0   :  { %11 = vsyncpa [#allocation3], 0  ;;  %s739_s0 = inlined_call_operand.hbm [shape: f32[8,11], index: 0, kind: input, shape index: {}]   ;;  %s740_s1 = inlined_call_operand.hbm [shape: f32[11,128], index: 1, kind: input, shape index: {}]   ;;  %s741_s2 = inlined_call_operand.vmem [shape: f32[1,128], index: 2, kind: input, shape index: {}]   ;;  %s742_s3 = inlined_call_operand.hbm [shape: f32[2,128,128], index: 3, kind: input, shape index: {}]   ;;  %s743_s4 = inlined_call_operand.hbm [shape: f32[8,32], index: 4, kind: output, shape index: {0}]   ;;  %s744_s5 = inlined_call_operand.vmem [shape: f32[8,1], index: 5, kind: output, shape index: {1}]  }
   0x1   :  { %12 = vsyncpa [#allocation6], 0 }
   0x2   :  { %13 = vsyncpa [#allocation4], 0  ;;  %s619_s18 = smov [#allocation5]   ;;  %s525_s22 = scalar_lea.hbm %s740_s1, 256 }
   0x3   :  { %s29_s19 = sshll.u32 %s619_s18, 4  ;;  %p526_p0 = scmp.ne.s32.totalorder %s740_s1, %s525_s22  ;;  %s30_s19 = int_to_ptr.vmem [resolvable:$true] %s29_s19 }
   0x4   :  { %p529_p1 = scmp.lt.u32.totalorder %s525_s22, %s740_s1 }
   0x6   :  { %p531_p2 = pnand %p529_p1, %p526_p0 }
   0x8   :  { %534 = shalt.err (!%p531_p2)
}
   0x9   :  { %s535_s27 = scalar_lea.vmem %s30_s19, 256  ;;  %p540_p4 = scmp.lt.s32.totalorder %s30_s19, %s30_s19 }
   0xa   :  { %p536_p3 = scmp.ne.s32.totalorder %s30_s19, %s535_s27  ;;  %p541_p5 = scmp.lt.s32.totalorder %s535_s27, %s535_s27 }
   0xc   :  { %p542_p6 = por %p541_p5, %p540_p4 }
   0xe   :  { %p543_p7 = pnand %p542_p6, %p536_p3 }
  0x10   :  { %546 = shalt.err (!%p543_p7)
}
  0x11   :  { %s620_s28 = smov 128   ;;  %s621_s29 = smov 8  }
  0x12   :  { %35 = dma.hbm_to_vmem [thread:$0]  %s740_s1, 256, %s30_s19, [#allocation6], %s620_s28, %s620_s28, %s621_s29  }
  0x13   :  { %s622_s7 = smov [#allocation2]   ;;  %s623_s9 = smov [#allocation7]  }
  0x14   :  { %s20_s8 = sshll.u32 %s622_s7, 4  ;;  %s43_s10 = sshll.u32 %s623_s9, 4  ;;  %s21_s8 = int_to_ptr.vmem [resolvable:$true] %s20_s8  ;;  %s44_s10 = int_to_ptr.vmem [resolvable:$true] %s43_s10 }
  0x15   :  { %s547_s13 = scalar_lea.hbm %s739_s0, 128 }
  0x16   :  { %p548_p8 = scmp.ne.s32.totalorder %s739_s0, %s547_s13  ;;  %p551_p9 = scmp.lt.u32.totalorder %s547_s13, %s739_s0 }
  0x18   :  { %p553_p10 = pnand %p551_p9, %p548_p8 }
  0x1a   :  { %556 = shalt.err (!%p553_p10)
}
  0x1b   :  { %s557_s1 = scalar_lea.vmem %s21_s8, 128  ;;  %p562_p12 = scmp.lt.s32.totalorder %s21_s8, %s21_s8 }
  0x1c   :  { %p558_p11 = scmp.ne.s32.totalorder %s21_s8, %s557_s1  ;;  %p563_p13 = scmp.lt.s32.totalorder %s557_s1, %s557_s1 }
  0x1e   :  { %p564_p0 = por %p563_p13, %p562_p12 }
  0x20   :  { %p565_p1 = pnand %p564_p0, %p558_p11 }
  0x22   :  { %568 = shalt.err (!%p565_p1)
}
  0x23   :  { %23 = dma.hbm_to_vmem [thread:$0]  %s739_s0, 128, %s21_s8, [#allocation3]  }
  0x24   :  { %s569_s22 = scalar_lea.hbm %s742_s3, 4096 }
  0x25   :  { %p570_p2 = scmp.ne.s32.totalorder %s742_s3, %s569_s22  ;;  %p573_p3 = scmp.lt.u32.totalorder %s569_s22, %s742_s3 }
  0x27   :  { %p575_p4 = pnand %p573_p3, %p570_p2 }
  0x29   :  { %578 = shalt.err (!%p575_p4)
}
  0x2a   :  { %s579_s27 = scalar_lea.vmem %s44_s10, 4096  ;;  %p584_p6 = scmp.lt.s32.totalorder %s44_s10, %s44_s10 }
  0x2b   :  { %p580_p5 = scmp.ne.s32.totalorder %s44_s10, %s579_s27  ;;  %p585_p7 = scmp.lt.s32.totalorder %s579_s27, %s579_s27 }
  0x2d   :  { %p586_p8 = por %p585_p7, %p584_p6 }
  0x2f   :  { %p587_p9 = pnand %p586_p8, %p580_p5 }
  0x31   :  { %590 = shalt.err (!%p587_p9)
}
  0x32   :  { %49 = dma.hbm_to_vmem [thread:$0]  %s742_s3, 4096, %s44_s10, [#allocation6], %s620_s28, %s620_s28, %s621_s29  }
  0x33   :  { %613 = dma.done.wait [#allocation3], 128  }
  0x34   :  { %614 = vsyncadd [#allocation3], 4294967168 }
  0x35   :  { %615 = dma.done.wait [#allocation6], 4352  }
  0x36   :  { %616 = vsyncadd [#allocation6], 4294962944  ;;  %v624_v0 = vmov 0.0|0.0   ;;  %vm625_vm0 = vmmov 0   ;;  %v626_v1 = vmov 0.0   ;;  %vm73_vm1 = vcmask 1042432  }
  0x37   :  { %463 = vmatprep.subr.bf16.mxu0 %v624_v0  ;;  %467 = vmatprep.subr.bf16.mxu1 %v624_v0  ;;  %v60_v2 = vld [vmem:[#allocation5] sm:$0xff]  ;;  %v61_v3 = vld [vmem:[#allocation5 + $0x8] sm:$0x7]  ;;  %vm627_vm2 = vmmov 1   ;;  %v148_v5 = vld [vmem:[#allocation7] sm:$0xff]  ;;  %vm69_vm4 = vcmask 89088  }
  0x38   :  { %390 = vmatprep.mubr.msk.f32.mxu0 %vm625_vm0, %v626_v1  ;;  %425 = vmatprep.mubr.msk.f32.mxu1 %vm625_vm0, %v626_v1  ;;  %vm465_vm3 = vmpackc.low %vm73_vm1, %vm627_vm2  ;;  %v464_v4 = vpack.c.bf16 %v61_v3, %v60_v2  ;;  %v149_v6 = vld [vmem:[#allocation7 + $0x8] sm:$0xff]  ;;  %v150_v7 = vld [vmem:[#allocation7 + $0x10] sm:$0xff]  ;;  %vm235_vm5 = vcmask 261120   ;;  %s628_s29 = smov [#allocation8]  }
  0x39   :  { %v468_v8 = vpack.c.bf16 %v149_v6, %v148_v5  ;;  %v151_v9 = vld [vmem:[#allocation7 + $0x18] sm:$0xff]  ;;  %v59_v10 = vld [vmem:[#allocation2] sm:$0xff]  ;;  %v152_v12 = vld [vmem:[#allocation7 + $0x20] sm:$0xff]  ;;  %s332_s6 = sshll.u32 %s628_s29, 4  ;;  %s333_s6 = int_to_ptr.vmem [resolvable:$true] %s332_s6 }
  0x3a   :  { %466 = vmatpush3.bf16.msk.msra.mxu0 %vm465_vm3, %v464_v4  ;;  %v471_v11 = vpack.c.bf16 %v151_v9, %v150_v7  ;;  %v153_v13 = vld [vmem:[#allocation7 + $0x28] sm:$0xff]  ;;  %v154_v15 = vld [vmem:[#allocation7 + $0x30] sm:$0xff]  ;;  %v155_v16 = vld [vmem:[#allocation7 + $0x38] sm:$0xff]  ;;  %s591_s7 = scalar_lea.vmem %s333_s6, 128  ;;  %p596_p11 = scmp.lt.s32.totalorder %s333_s6, %s333_s6 }
  0x3b   :  { %469 = vmatpush3.bf16.msra.mxu1 %v468_v8  ;;  %491 = vmatprep.subr.bf16.mxu0 %v624_v0  ;;  %v474_v14 = vpack.c.bf16 %v153_v13, %v152_v12  ;;  %v477_v17 = vpack.c.bf16 %v155_v16, %v154_v15  ;;  %v156_v18 = vld [vmem:[#allocation7 + $0x40] sm:$0xff]  ;;  %v157_v19 = vld [vmem:[#allocation7 + $0x48] sm:$0xff]  ;;  %v158_v21 = vld [vmem:[#allocation7 + $0x50] sm:$0xff]  ;;  %p592_p10 = scmp.ne.s32.totalorder %s333_s6, %s591_s7  ;;  %p597_p12 = scmp.lt.s32.totalorder %s591_s7, %s591_s7 }
  0x3c   :  { %470 = vmatprep.subr.bf16.mxu1 %v624_v0  ;;  %v480_v20 = vpack.c.bf16 %v157_v19, %v156_v18  ;;  %v159_v22 = vld [vmem:[#allocation7 + $0x58] sm:$0xff]  ;;  %v160_v24 = vld [vmem:[#allocation7 + $0x60] sm:$0xff]  ;;  %v161_v25 = vld [vmem:[#allocation7 + $0x68] sm:$0xff] }
  0x3d   :  { %391 = vmatmul.mubr.msk.f32.vlgmr.msra.gmra.mrb[0].mxu0 %vm69_vm4, %v59_v10  ;;  %v483_v23 = vpack.c.bf16 %v159_v22, %v158_v21  ;;  %v486_v26 = vpack.c.bf16 %v161_v25, %v160_v24  ;;  %v162_v27 = vld [vmem:[#allocation7 + $0x70] sm:$0xff]  ;;  %v163_v28 = vld [vmem:[#allocation7 + $0x78] sm:$0xff]  ;;  %v238_v30 = vld [vmem:[#allocation7 + $0x80] sm:$0xff]  ;;  %p598_p13 = por %p597_p12, %p596_p11 }
  0x3e   :  { %460 = vmatprep.mubr.msk.f32.mxu0 %vm625_vm0, %v626_v1  ;;  %v489_v29 = vpack.c.bf16 %v163_v28, %v162_v27  ;;  %v239_v31 = vld [vmem:[#allocation7 + $0x88] sm:$0xff]  ;;  %v240_v32 = vld [vmem:[#allocation7 + $0x90] sm:$0xff]  ;;  %v241_v34 = vld [vmem:[#allocation7 + $0x98] sm:$0xff] }
  0x3f   :  { %472 = vmatpush3.bf16.msra.mxu1 %v471_v11  ;;  %v492_v33 = vpack.c.bf16 %v239_v31, %v238_v30  ;;  %v495_v35 = vpack.c.bf16 %v241_v34, %v240_v32  ;;  %v242_v36 = vld [vmem:[#allocation7 + $0xa0] sm:$0xff]  ;;  %v243_v37 = vld [vmem:[#allocation7 + $0xa8] sm:$0xff]  ;;  %v244_v39 = vld [vmem:[#allocation7 + $0xb0] sm:$0xff]  ;;  %p599_p0 = pnand %p598_p13, %p592_p10 }
  0x40   :  { %473 = vmatprep.subr.bf16.mxu1 %v624_v0  ;;  %v498_v38 = vpack.c.bf16 %v243_v37, %v242_v36  ;;  %v245_v40 = vld [vmem:[#allocation7 + $0xb8] sm:$0xff]  ;;  %v246_v42 = vld [vmem:[#allocation7 + $0xc0] sm:$0xff]  ;;  %v247_v43 = vld [vmem:[#allocation7 + $0xc8] sm:$0xff] }
  0x41   :  { %493 = vmatpush3.bf16.msra.mxu0 %v492_v33  ;;  %v501_v41 = vpack.c.bf16 %v245_v40, %v244_v39  ;;  %v504_v44 = vpack.c.bf16 %v247_v43, %v246_v42  ;;  %v248_v45 = vld [vmem:[#allocation7 + $0xd0] sm:$0xff]  ;;  %v249_v46 = vld [vmem:[#allocation7 + $0xd8] sm:$0xff]  ;;  %v250_v48 = vld [vmem:[#allocation7 + $0xe0] sm:$0xff] }
  0x42   :  { %494 = vmatprep.subr.bf16.mxu0 %v624_v0  ;;  %v507_v47 = vpack.c.bf16 %v249_v46, %v248_v45  ;;  %v251_v49 = vld [vmem:[#allocation7 + $0xe8] sm:$0xff]  ;;  %v252_v56 = vld [vmem:[#allocation7 + $0xf0] sm:$0xff]  ;;  %v253_v57 = vld [vmem:[#allocation7 + $0xf8] sm:$0xff] }
  0x43   :  { %475 = vmatpush3.bf16.msra.mxu1 %v474_v14  ;;  %v510_v50 = vpack.c.bf16 %v251_v49, %v250_v48  ;;  %v346_v51 = vld [vmem:[%s741_s2] ss:$0 sm:$0xff]  ;;  %v513_v58 = vpack.c.bf16 %v253_v57, %v252_v56 }
  0x44   :  { %476 = vmatprep.subr.bf16.mxu1 %v624_v0 }
  0x45   :  { %496 = vmatpush3.bf16.msra.mxu0 %v495_v35 }
  0x46   :  { %497 = vmatprep.subr.bf16.mxu0 %v624_v0 }
  0x47   :  { %478 = vmatpush3.bf16.msra.mxu1 %v477_v17 }
  0x48   :  { %479 = vmatprep.subr.bf16.mxu1 %v624_v0 }
  0x49   :  { %499 = vmatpush3.bf16.msra.mxu0 %v498_v38 }
  0x4a   :  { %500 = vmatprep.subr.bf16.mxu0 %v624_v0 }
  0x4b   :  { %481 = vmatpush3.bf16.msra.mxu1 %v480_v20 }
  0x4c   :  { %482 = vmatprep.subr.bf16.mxu1 %v624_v0 }
  0x4d   :  { %502 = vmatpush3.bf16.msra.mxu0 %v501_v41 }
  0x4e   :  { %503 = vmatprep.subr.bf16.mxu0 %v624_v0 }
  0x4f   :  { %484 = vmatpush3.bf16.msra.mxu1 %v483_v23 }
  0x50   :  { %485 = vmatprep.subr.bf16.mxu1 %v624_v0 }
  0x51   :  { %505 = vmatpush3.bf16.msra.mxu0 %v504_v44 }
  0x52   :  { %506 = vmatprep.subr.bf16.mxu0 %v624_v0 }
  0x53   :  { %487 = vmatpush3.bf16.msra.mxu1 %v486_v26 }
  0x54   :  { %488 = vmatprep.subr.bf16.mxu1 %v624_v0 }
  0x55   :  { %508 = vmatpush3.bf16.msra.mxu0 %v507_v47 }
  0x56   :  { %509 = vmatprep.subr.bf16.mxu0 %v624_v0 }
  0x57   :  { %490 = vmatpush3.bf16.msra.mxu1 %v489_v29 }
  0x59   :  { %511 = vmatpush3.bf16.msra.mxu0 %v510_v50 }
  0x5a   :  { %512 = vmatprep.subr.bf16.mxu0 %v624_v0 }
  0x5d   :  { %514 = vmatpush3.bf16.msra.mxu0 %v513_v58 }
 0x110   :  { %v143_v52 = vpop.f32.mrb[0].mxu0 }
 0x111   :  { %v144_v53 = vadd.f32 %v346_v51, %v143_v52  ;;  %v392_v54 = vpop.f32.mrb[1].mxu0 }
 0x113   :  { %v147_v55 = vmax.f32 %v144_v53, 0.0 }
 0x115   :  { %426 = vmatmul.mubr.f32.vlgmr.msra.gmra.mrb[0].mxu1 %v147_v55 }
 0x1e8   :  { %v230_v59 = vpop.f32.mrb[0].mxu1 }
 0x1e9   :  { %v234_v60 = vmax.f32 %v230_v59, 0.0  ;;  %v427_v61 = vpop.f32.mrb[1].mxu1 }
 0x1eb   :  { %461 = vmatmul.mubr.f32.vlgmr.msra.gmra.mrb[2].mxu0 %v234_v60  ;;  %236 = vst.msk [vmem:[#allocation8] sm:$0xff] %vm235_vm5, %v234_v60 }
 0x1ec   :  { %602 = shalt.err (!%p599_p0)
}
 0x1ed   :  { %s603_s9 = scalar_lea.hbm %s743_s4, 128 }
 0x1ee   :  { %p604_p1 = scmp.ne.s32.totalorder %s743_s4, %s603_s9  ;;  %p607_p2 = scmp.lt.u32.totalorder %s603_s9, %s743_s4 }
 0x1f0   :  { %p609_p3 = pnand %p607_p2, %p604_p1 }
 0x1f2   :  { %612 = shalt.err (!%p609_p3)
}
 0x1f3   :  { %335 = dma.vmem_to_hbm [thread:$0]  %s333_s6, 128, %s743_s4, [#allocation4]   ;;  %vm324_vm6 = vcmask 7168  }
 0x2be   :  { %v320_v62 = vpop.f32.mrb[2].mxu0 }
 0x2bf   :  { %325 = vst.msk [vmem:[%s744_s5] sm:$0xff] %vm324_vm6, %v320_v62  ;;  %v462_v63 = vpop.f32.mrb[3].mxu0 }
 0x2c0   :  { %617 = dma.done.wait [#allocation4], 128  }
 0x2c1   :  { %618 = vsyncadd [#allocation4], 4294967168 }
 0x2c2   :  { %343 = vsyncpa [#allocation3], 1 }
 0x2c3   :  { %344 = vsyncpa [#allocation6], 1 }
 0x2c4   :  { %345 = vsyncpa [#allocation4], 1 }

</bundles_post_ra>
